<compile_context>
chip_gen: v7x
topology: tpu7x:2x2x1
jax: 0.10.0
libtpu: 0.0.40
codegen_flags: <defaults>
</compile_context>

<pallas_src>
import functools

import jax
import jax.numpy as jnp
from jax import lax
from jax.experimental import pallas as pl
from jax.experimental.pallas import tpu as pltpu


_MAX_TILE_T = 2048              # lanes per time tile (multiple of 128)
_TARGET_BLOCK_BYTES = 2 << 20   # ~2 MiB per (Bb, F, TILE_T) block


def _fbank_aug_kernel(t_pos_ref, t_len_ref, f_pos_ref, f_len_ref, x_ref, o_ref):
    """Zero x where the per-batch time OR freq mask hits (single elementwise pass).

    t_pos_ref/t_len_ref/f_pos_ref/f_len_ref: VMEM (Bb, 1, 1) int32 per-batch scalars.
    x_ref / o_ref: VMEM (Bb, F, TILE_T) block (o aliases x in HBM).
    """
    bb, F, tt = x_ref.shape
    t0 = pl.program_id(1) * tt  # element offset of this time tile

    # Per-axis keep vectors at small shapes (unsigned range test: keep iff
    # (idx - pos) as uint32 >= len; negative differences wrap to huge values -> kept).
    t_idx = lax.broadcasted_iota(jnp.int32, (1, 1, tt), 2) + t0           # (1,1,Tt)
    f_idx = lax.broadcasted_iota(jnp.int32, (1, F, 1), 1)                 # (1,F,1)
    t_keep = (t_idx - t_pos_ref[...]).astype(jnp.uint32) >= \
        t_len_ref[...].astype(jnp.uint32)                                 # (Bb,1,Tt)
    f_keep = (f_idx - f_pos_ref[...]).astype(jnp.uint32) >= \
        f_len_ref[...].astype(jnp.uint32)                                 # (Bb,F,1)

    keep = jnp.logical_and(t_keep, f_keep)                                # (Bb,F,Tt)
    o_ref[...] = jnp.where(keep, x_ref[...],
                           jnp.zeros((), o_ref.dtype)).astype(o_ref.dtype)


def _choose_tiles(B, F, T, itemsize):
    """Pick (Bb, TILE_T) so blocks are ~1-2 MiB, lane-dense, and VMEM-safe."""
    if T % 128 == 0:
        tile_t = min(T, _MAX_TILE_T)
    elif T > _MAX_TILE_T:
        tile_t = _MAX_TILE_T          # tail tile is partial; Pallas masks its stores
    else:
        tile_t = T                    # full-extent last dim (always legal)
    per_batch = F * tile_t * itemsize
    bb = int(max(1, min(B, _TARGET_BLOCK_BYTES // max(1, per_batch))))
    return bb, int(tile_t)


def _sample_mask_params(key, B, F, T, freq_mask_width, time_mask_width):
    """Per-batch [t_pos, t_len, f_pos, f_len] (B,4) int32, matching torch.randint."""
    k1, k2, k3, k4 = jax.random.split(key, 4)
    t_len = jax.random.randint(k1, (B,), time_mask_width[0], time_mask_width[1],
                               dtype=jnp.int32)
    t_pos = jax.random.randint(k2, (B,), 0,
                               jnp.maximum(1, T - jnp.max(t_len)), dtype=jnp.int32)
    f_len = jax.random.randint(k3, (B,), freq_mask_width[0], freq_mask_width[1],
                               dtype=jnp.int32)
    f_pos = jax.random.randint(k4, (B,), 0,
                               jnp.maximum(1, F - jnp.max(f_len)), dtype=jnp.int32)
    return jnp.stack([t_pos, t_len, f_pos, f_len], axis=1)


def apply_fbank_masks(x, mask_params):
    """Pallas: apply time+freq zero-masks given per-batch scalars, writing in place."""
    B, F, T = x.shape
    itemsize = jnp.dtype(x.dtype).itemsize
    bb, tile_t = _choose_tiles(B, F, T, itemsize)

    t_pos = mask_params[:, 0].reshape(B, 1, 1)
    t_len = mask_params[:, 1].reshape(B, 1, 1)
    f_pos = mask_params[:, 2].reshape(B, 1, 1)
    f_len = mask_params[:, 3].reshape(B, 1, 1)

    param_spec = pl.BlockSpec((bb, 1, 1), lambda b, t: (b, 0, 0))
    x_spec = pl.BlockSpec((bb, F, tile_t), lambda b, t: (b, 0, t))

    return pl.pallas_call(
        _fbank_aug_kernel,
        out_shape=jax.ShapeDtypeStruct((B, F, T), x.dtype),
        grid=(pl.cdiv(B, bb), pl.cdiv(T, tile_t)),
        in_specs=[param_spec, param_spec, param_spec, param_spec, x_spec],
        out_specs=x_spec,
        input_output_aliases={4: 0},   # x (input index 4) aliases the output buffer
        compiler_params=pltpu.CompilerParams(
            dimension_semantics=("parallel", "parallel")),
        cost_estimate=pl.CostEstimate(
            flops=3 * B * F * T,
            transcendentals=0,
            bytes_accessed=2 * B * F * T * itemsize),
    )(t_pos, t_len, f_pos, f_len, x)


@functools.partial(jax.jit,
                   static_argnames=("freq_mask_width", "time_mask_width"),
                   donate_argnums=(0,))
def fbank_aug(x, key, freq_mask_width=(0, 8), time_mask_width=(0, 10)):
    """FbankAug.forward: time mask (dim=2) then freq mask (dim=1), fused in one pass."""
    B, F, T = x.shape
    mask_params = _sample_mask_params(key, B, F, T, freq_mask_width, time_mask_width)
    return apply_fbank_masks(x, mask_params)


def _fbank_aug_ref(x, mask_params):
    """Pure-jnp reference with identical mask scalars."""
    B, F, T = x.shape
    t_pos = mask_params[:, 0][:, None, None]
    t_len = mask_params[:, 1][:, None, None]
    f_pos = mask_params[:, 2][:, None, None]
    f_len = mask_params[:, 3][:, None, None]
    t_idx = jnp.arange(T, dtype=jnp.int32)[None, None, :]
    f_idx = jnp.arange(F, dtype=jnp.int32)[None, :, None]
    t_mask = (t_idx >= t_pos) & (t_idx < t_pos + t_len)
    f_mask = (f_idx >= f_pos) & (f_idx < f_pos + f_len)
    return jnp.where(t_mask | f_mask, 0.0, x)


if __name__ == "__main__":
    # Typical fbank layout: (batch, n_mels, time). Small, lane-friendly demo shapes.
    B, F, T = 2, 80, 128
    freq_mask_width, time_mask_width = (0, 8), (0, 10)

    key = jax.random.PRNGKey(0)
    kx, km = jax.random.split(key)
    x = jax.random.normal(kx, (B, F, T), jnp.float32)

    # Reference (same deterministic mask scalars) is computed BEFORE the kernel call,
    # since x is donated to (and overwritten in place by) the Pallas call.
    mask_params = _sample_mask_params(km, B, F, T, freq_mask_width, time_mask_width)
    ref = jax.block_until_ready(_fbank_aug_ref(x, mask_params))

    out = fbank_aug(x, km, freq_mask_width=freq_mask_width,
                    time_mask_width=time_mask_width)
    out = jax.block_until_ready(out)

    assert out.shape == (B, F, T), out.shape
    assert bool(jnp.all(jnp.isfinite(out)))
    assert jnp.allclose(out, ref), "Pallas FbankAug mismatch vs reference"
    print("KERNEL_OK")
</pallas_src>

<mosaic_0001>
module attributes {stable_mosaic.version = 11 : i64} {
  func.func @_fbank_aug_kernel(%arg0: i32, %arg1: i32, %arg2: memref<2x1x1xi32, #tpu.memory_space<vmem>>, %arg3: memref<2x1x1xi32, #tpu.memory_space<vmem>>, %arg4: memref<2x1x1xi32, #tpu.memory_space<vmem>>, %arg5: memref<2x1x1xi32, #tpu.memory_space<vmem>>, %arg6: memref<2x80x128xf32, #tpu.memory_space<vmem>>, %arg7: memref<2x80x128xf32, #tpu.memory_space<vmem>>) attributes {dimension_semantics = [#tpu.dimension_semantics<parallel>, #tpu.dimension_semantics<parallel>], iteration_bounds = array<i64: 1, 1>, scalar_prefetch = 0 : i64, scratch_operands = 0 : i64, tpu.core_type = #tpu.core_type<tc>, window_params = [{transform_indices = @transform_0, window_bounds = array<i64: 2, 1, 1>}, {transform_indices = @transform_1, window_bounds = array<i64: 2, 1, 1>}, {transform_indices = @transform_2, window_bounds = array<i64: 2, 1, 1>}, {transform_indices = @transform_3, window_bounds = array<i64: 2, 1, 1>}, {transform_indices = @transform_4, window_bounds = array<i64: 2, 80, 128>}, {transform_indices = @transform_5, window_bounds = array<i64: 2, 80, 128>}]} {
    %c128_i32 = arith.constant 128 : i32
    %0 = arith.muli %arg1, %c128_i32 : i32
    %1 = tpu.iota {dimensions = array<i32: 2>} : vector<1x1x128xi32>
    %2 = vector.broadcast %0 : i32 to vector<1x1x128xi32>
    %3 = arith.addi %1, %2 : vector<1x1x128xi32>
    %4 = tpu.iota {dimensions = array<i32: 1>} : vector<1x80x1xi32>
    %c0 = arith.constant 0 : index
    %c0_0 = arith.constant 0 : index
    %c0_1 = arith.constant 0 : index
    %5 = vector.load %arg2[%c0, %c0_0, %c0_1] : memref<2x1x1xi32, #tpu.memory_space<vmem>>, vector<2x1x1xi32>
    %6 = vector.broadcast %3 : vector<1x1x128xi32> to vector<2x1x128xi32>
    %7 = vector.broadcast %5 : vector<2x1x1xi32> to vector<2x1x128xi32>
    %8 = arith.subi %6, %7 : vector<2x1x128xi32>
    %c0_2 = arith.constant 0 : index
    %c0_3 = arith.constant 0 : index
    %c0_4 = arith.constant 0 : index
    %9 = vector.load %arg3[%c0_2, %c0_3, %c0_4] : memref<2x1x1xi32, #tpu.memory_space<vmem>>, vector<2x1x1xi32>
    %10 = vector.broadcast %9 : vector<2x1x1xi32> to vector<2x1x128xi32>
    %11 = arith.cmpi uge, %8, %10 : vector<2x1x128xi32>
    %c0_5 = arith.constant 0 : index
    %c0_6 = arith.constant 0 : index
    %c0_7 = arith.constant 0 : index
    %12 = vector.load %arg4[%c0_5, %c0_6, %c0_7] : memref<2x1x1xi32, #tpu.memory_space<vmem>>, vector<2x1x1xi32>
    %13 = vector.broadcast %4 : vector<1x80x1xi32> to vector<2x80x1xi32>
    %14 = vector.broadcast %12 : vector<2x1x1xi32> to vector<2x80x1xi32>
    %15 = arith.subi %13, %14 : vector<2x80x1xi32>
    %c0_8 = arith.constant 0 : index
    %c0_9 = arith.constant 0 : index
    %c0_10 = arith.constant 0 : index
    %16 = vector.load %arg5[%c0_8, %c0_9, %c0_10] : memref<2x1x1xi32, #tpu.memory_space<vmem>>, vector<2x1x1xi32>
    %17 = vector.broadcast %16 : vector<2x1x1xi32> to vector<2x80x1xi32>
    %18 = arith.cmpi uge, %15, %17 : vector<2x80x1xi32>
    %19 = vector.broadcast %11 : vector<2x1x128xi1> to vector<2x80x128xi1>
    %20 = vector.broadcast %18 : vector<2x80x1xi1> to vector<2x80x128xi1>
    %21 = arith.andi %19, %20 : vector<2x80x128xi1>
    %c0_11 = arith.constant 0 : index
    %c0_12 = arith.constant 0 : index
    %c0_13 = arith.constant 0 : index
    %22 = vector.load %arg6[%c0_11, %c0_12, %c0_13] : memref<2x80x128xf32, #tpu.memory_space<vmem>>, vector<2x80x128xf32>
    %cst = arith.constant 0.000000e+00 : f32
    %23 = vector.broadcast %cst : f32 to vector<2x80x128xf32>
    %24 = arith.select %21, %22, %23 : vector<2x80x128xi1>, vector<2x80x128xf32>
    %c0_14 = arith.constant 0 : index
    %c0_15 = arith.constant 0 : index
    %c0_16 = arith.constant 0 : index
    %25 = vector.load %arg7[%c0_14, %c0_15, %c0_16] : memref<2x80x128xf32, #tpu.memory_space<vmem>>, vector<2x80x128xf32>
    tpu.vector_store %arg7[%c0_14, %c0_15, %c0_16], %24 {strides = array<i32>} : memref<2x80x128xf32, #tpu.memory_space<vmem>>, vector<2x80x128xf32>,
    return
  }
  func.func @transform_0(%arg0: i32, %arg1: i32) -> (i32, i32, i32) {
    %c0_i32 = arith.constant 0 : i32
    %c0_i32_0 = arith.constant 0 : i32
    %c0_i32_1 = arith.constant 0 : i32
    return %arg0, %c0_i32, %c0_i32_0 : i32, i32, i32
  }
  func.func @transform_1(%arg0: i32, %arg1: i32) -> (i32, i32, i32) {
    %c0_i32 = arith.constant 0 : i32
    %c0_i32_0 = arith.constant 0 : i32
    %c0_i32_1 = arith.constant 0 : i32
    return %arg0, %c0_i32, %c0_i32_0 : i32, i32, i32
  }
  func.func @transform_2(%arg0: i32, %arg1: i32) -> (i32, i32, i32) {
    %c0_i32 = arith.constant 0 : i32
    %c0_i32_0 = arith.constant 0 : i32
    %c0_i32_1 = arith.constant 0 : i32
    return %arg0, %c0_i32, %c0_i32_0 : i32, i32, i32
  }
  func.func @transform_3(%arg0: i32, %arg1: i32) -> (i32, i32, i32) {
    %c0_i32 = arith.constant 0 : i32
    %c0_i32_0 = arith.constant 0 : i32
    %c0_i32_1 = arith.constant 0 : i32
    return %arg0, %c0_i32, %c0_i32_0 : i32, i32, i32
  }
  func.func @transform_4(%arg0: i32, %arg1: i32) -> (i32, i32, i32) {
    %c0_i32 = arith.constant 0 : i32
    %c0_i32_0 = arith.constant 0 : i32
    return %arg0, %c0_i32, %arg1 : i32, i32, i32
  }
  func.func @transform_5(%arg0: i32, %arg1: i32) -> (i32, i32, i32) {
    %c0_i32 = arith.constant 0 : i32
    %c0_i32_0 = arith.constant 0 : i32
    return %arg0, %c0_i32, %arg1 : i32, i32, i32
  }
}

</mosaic_0001>

<bundles_post_ra>
// kernel: fbank_aug.1
= control target key start
LH: loop header
LB: loop body
LE: loop exit
PB: predicated region body
PF: predicated region fallthrough
CT: control target
= control target key end

     0   :  { %10 = vsyncpa [#allocation3], 0  ;;  %s606_s0 = inlined_call_operand.vmem [shape: s32[2,1,1], index: 0, kind: input, shape index: {}]   ;;  %s607_s1 = inlined_call_operand.vmem [shape: s32[2,1,1], index: 1, kind: input, shape index: {}]   ;;  %s608_s2 = inlined_call_operand.vmem [shape: s32[2,1,1], index: 2, kind: input, shape index: {}]   ;;  %s609_s3 = inlined_call_operand.vmem [shape: s32[2,1,1], index: 3, kind: input, shape index: {}]   ;;  %s610_s4 = inlined_call_operand.hbm [shape: f32[2,80,128], index: 4, kind: input, shape index: {}, may-alias: {4,5}]   ;;  %s611_s5 = inlined_call_operand.hbm [shape: f32[2,80,128], index: 5, kind: output, shape index: {}, may-alias: {4,5}]  }
   0x1   :  { %11 = vsyncpa [#allocation4], 0  ;;  %s407_s18 = smov [#allocation2]   ;;  %s359_s22 = scalar_lea.hbm %s610_s4, 2560 }
   0x2   :  { %s25_s19 = sshll.u32 %s407_s18, 4  ;;  %p360_p0 = scmp.ne.s32.totalorder %s610_s4, %s359_s22  ;;  %s26_s19 = int_to_ptr.vmem [resolvable:$true] %s25_s19 }
   0x3   :  { %p363_p1 = scmp.lt.u32.totalorder %s359_s22, %s610_s4 }
   0x5   :  { %p365_p2 = pnand %p363_p1, %p360_p0 }
   0x7   :  { %368 = shalt.err (!%p365_p2)
}
   0x8   :  { %s369_s27 = scalar_lea.vmem %s26_s19, 2560  ;;  %p374_p4 = scmp.lt.s32.totalorder %s26_s19, %s26_s19 }
   0x9   :  { %p370_p3 = scmp.ne.s32.totalorder %s26_s19, %s369_s27  ;;  %p375_p5 = scmp.lt.s32.totalorder %s369_s27, %s369_s27 }
   0xb   :  { %p376_p6 = por %p375_p5, %p374_p4 }
   0xd   :  { %p377_p7 = pnand %p376_p6, %p370_p3 }
   0xf   :  { %380 = shalt.err (!%p377_p7)
}
  0x10   :  { %s408_s28 = smov 128   ;;  %s409_s29 = smov 8  }
  0x11   :  { %31 = dma.hbm_to_vmem [thread:$0]  %s610_s4, 2560, %s26_s19, [#allocation3], %s408_s28, %s408_s28, %s409_s29  }
  0x12   :  { %403 = dma.done.wait [#allocation3], 2560  }
  0x13   :  { %404 = vsyncadd [#allocation3], 4294964736  ;;  %v36_v0 = vlaneseq  ;;  %v410_v1 = vmov 0   ;;  %v69_v6 = vld [vmem:[%s607_s1] sm:$0x1] }
  0x14   :  { %358 = vset.pattern.permute.xlu1 %v410_v1  ;;  %357 = vset.pattern.permute.xlu0 %v410_v1  ;;  %v51_v7 = vld [vmem:[%s606_s0] sm:$0x1]  ;;  %v70_v10 = vld [vmem:[%s607_s1 + $0x1] sm:$0x1] }
  0x15   :  { %v460_v2 = vshrl.u32 %v36_v0, 7  ;;  %72 = vperm.xlu1 %358, %v69_v6   ;;  %54 = vperm.xlu0 %357, %v51_v7   ;;  %v348_v8 = vld [vmem:[%s608_s2] ss:$0 sm:$0xff]  ;;  %v52_v11 = vld [vmem:[%s606_s0 + $0x1] sm:$0x1]  ;;  %v37_v61 = vand.u32 127, %v36_v0 }
  0x16   :  { %v350_v9 = vld [vmem:[%s609_s3] ss:$0 sm:$0xff]  ;;  %v349_v34 = vld [vmem:[%s608_s2 + $0x1] ss:$0 sm:$0xff]  ;;  %v271_v0 = vld [vmem:[#allocation2] sm:$0xff]  ;;  %s411_s2 = smov [#allocation5]  }
  0x17   :  { %v42_v3 = vadd.s32 8, %v460_v2  ;;  %v464_v4 = vadd.s32 24, %v460_v2  ;;  %v467_v5 = vadd.s32 16, %v460_v2  ;;  %v97_v13 = vsub.s32 %v460_v2, %v348_v8  ;;  %v351_v39 = vld [vmem:[%s609_s3 + $0x1] ss:$0 sm:$0xff]  ;;  %s336_s3 = sshll.u32 %s411_s2, 4  ;;  %s337_s3 = int_to_ptr.vmem [resolvable:$true] %s336_s3 }
  0x18   :  { %v491_v16 = vadd.s32 40, %v460_v2  ;;  %v494_v17 = vadd.s32 32, %v460_v2  ;;  %v499_v20 = vadd.s32 56, %v460_v2  ;;  %v502_v21 = vadd.s32 48, %v460_v2  ;;  %s381_s20 = scalar_lea.vmem %s337_s3, 2560  ;;  %p386_p9 = scmp.lt.s32.totalorder %s337_s3, %s337_s3 }
  0x19   :  { %v98_v12 = vsub.s32 %v42_v3, %v348_v8  ;;  %v100_v14 = vsub.s32 %v464_v4, %v348_v8  ;;  %v99_v15 = vsub.s32 %v467_v5, %v348_v8  ;;  %vm127_vm1 = vcmp.ge.u32.totalorder %v97_v13, %v350_v9  ;;  %79 = vperm.xlu1 %358, %v70_v10   ;;  %p382_p8 = scmp.ne.s32.totalorder %s337_s3, %s381_s20  ;;  %p387_p10 = scmp.lt.s32.totalorder %s381_s20, %s381_s20 }
  0x1a   :  { %61 = vperm.xlu0 %357, %v52_v11   ;;  %v151_v19 = vsel %vm127_vm1, 1, %v410_v1  ;;  %v102_v22 = vsub.s32 %v491_v16, %v348_v8  ;;  %v101_v23 = vsub.s32 %v494_v17, %v348_v8  ;;  %v50_v26 = vadd.s32 72, %v460_v2  ;;  %v272_v11 = vld [vmem:[#allocation2 + $0x8] sm:$0xff] }
  0x1b   :  { %vm128_vm0 = vcmp.ge.u32.totalorder %v98_v12, %v350_v9  ;;  %vm130_vm2 = vcmp.ge.u32.totalorder %v100_v14, %v350_v9  ;;  %vm129_vm3 = vcmp.ge.u32.totalorder %v99_v15, %v350_v9  ;;  %v49_v27 = vadd.s32 64, %v460_v2  ;;  %p388_p11 = por %p387_p10, %p386_p9 }
  0x1c   :  { %v152_v18 = vsel %vm128_vm0, 1, %v410_v1  ;;  %v154_v24 = vsel %vm130_vm2, 1, %v410_v1  ;;  %v153_v25 = vsel %vm129_vm3, 1, %v410_v1  ;;  %vm132_vm4 = vcmp.ge.u32.totalorder %v102_v22, %v350_v9  ;;  %v276_v22 = vld [vmem:[#allocation2 + $0x28] sm:$0xff] }
  0x1d   :  { %175 = vperm.xlu1 %358, %v152_v18   ;;  %vm131_vm5 = vcmp.ge.u32.totalorder %v101_v23, %v350_v9  ;;  %v104_v28 = vsub.s32 %v499_v20, %v348_v8  ;;  %v103_v29 = vsub.s32 %v502_v21, %v348_v8  ;;  %v156_v30 = vsel %vm132_vm4, 1, %v410_v1  ;;  %p389_p12 = pnand %p388_p11, %p382_p8 }
  0x1e   :  { %172 = vperm.xlu0 %357, %v151_v19   ;;  %v155_v31 = vsel %vm131_vm5, 1, %v410_v1  ;;  %v106_v32 = vsub.s32 %v50_v26, %v348_v8  ;;  %v105_v33 = vsub.s32 %v49_v27, %v348_v8  ;;  %v108_v37 = vsub.s32 %v42_v3, %v349_v34  ;;  %v273_v19 = vld [vmem:[#allocation2 + $0x10] sm:$0xff] }
  0x1f   :  { %vm134_vm6 = vcmp.ge.u32.totalorder %v104_v28, %v350_v9  ;;  %vm133_vm7 = vcmp.ge.u32.totalorder %v103_v29, %v350_v9  ;;  %v107_v38 = vsub.s32 %v460_v2, %v349_v34  ;;  %v110_v42 = vsub.s32 %v464_v4, %v349_v34  ;;  %v278_v28 = vld [vmem:[#allocation2 + $0x38] sm:$0xff] }
  0x20   :  { %v158_v35 = vsel %vm134_vm6, 1, %v410_v1  ;;  %v157_v36 = vsel %vm133_vm7, 1, %v410_v1  ;;  %vm136_vm8 = vcmp.ge.u32.totalorder %v106_v32, %v350_v9  ;;  %vm135_vm9 = vcmp.ge.u32.totalorder %v105_v33, %v350_v9 }
  0x21   :  { %181 = vperm.xlu1 %358, %v154_v24   ;;  %v160_v40 = vsel %vm136_vm8, 1, %v410_v1  ;;  %v159_v41 = vsel %vm135_vm9, 1, %v410_v1  ;;  %vm138_vm10 = vcmp.ge.u32.totalorder %v108_v37, %v351_v39  ;;  %vm137_vm11 = vcmp.ge.u32.totalorder %v107_v38, %v351_v39  ;;  %v279_v37 = vld [vmem:[#allocation2 + $0x40] sm:$0xff] }
  0x22   :  { %178 = vperm.xlu0 %357, %v153_v25   ;;  %v109_v43 = vsub.s32 %v467_v5, %v349_v34  ;;  %v162_v44 = vsel %vm138_vm10, 1, %v410_v1  ;;  %v161_v45 = vsel %vm137_vm11, 1, %v410_v1  ;;  %vm140_vm12 = vcmp.ge.u32.totalorder %v110_v42, %v351_v39  ;;  %v275_v25 = vld [vmem:[#allocation2 + $0x20] sm:$0xff] }
  0x23   :  { %v112_v46 = vsub.s32 %v491_v16, %v349_v34  ;;  %v111_v47 = vsub.s32 %v494_v17, %v349_v34  ;;  %v164_v48 = vsel %vm140_vm12, 1, %v410_v1  ;;  %v114_v50 = vsub.s32 %v499_v20, %v349_v34  ;;  %v274_v16 = vld [vmem:[#allocation2 + $0x18] sm:$0xff] }
  0x24   :  { %vm139_vm13 = vcmp.ge.u32.totalorder %v109_v43, %v351_v39  ;;  %v113_v51 = vsub.s32 %v502_v21, %v349_v34  ;;  %v116_v54 = vsub.s32 %v50_v26, %v349_v34  ;;  %v115_v55 = vsub.s32 %v49_v27, %v349_v34  ;;  %v280_v34 = vld [vmem:[#allocation2 + $0x48] sm:$0xff]  ;;  %v281_v43 = vld [vmem:[#allocation2 + $0x50] sm:$0xff] }
  0x25   :  { %187 = vperm.xlu1 %358, %v156_v30   ;;  %v163_v49 = vsel %vm139_vm13, 1, %v410_v1  ;;  %vm142_vm14 = vcmp.ge.u32.totalorder %v112_v46, %v351_v39  ;;  %vm141_vm15 = vcmp.ge.u32.totalorder %v111_v47, %v351_v39  ;;  %vm144_vm0 = vcmp.ge.u32.totalorder %v114_v50, %v351_v39  ;;  %v284_v46 = vld [vmem:[#allocation2 + $0x68] sm:$0xff] }
  0x26   :  { %184 = vperm.xlu0 %357, %v155_v31   ;;  %v166_v52 = vsel %vm142_vm14, 1, %v410_v1  ;;  %v165_v53 = vsel %vm141_vm15, 1, %v410_v1  ;;  %vm143_vm1 = vcmp.ge.u32.totalorder %v113_v51, %v351_v39  ;;  %v168_v56 = vsel %vm144_vm0, 1, %v410_v1  ;;  %v277_v31 = vld [vmem:[#allocation2 + $0x30] sm:$0xff] }
  0x27   :  { %v167_v57 = vsel %vm143_vm1, 1, %v410_v1  ;;  %vm146_vm2 = vcmp.ge.u32.totalorder %v116_v54, %v351_v39  ;;  %vm145_vm3 = vcmp.ge.u32.totalorder %v115_v55, %v351_v39  ;;  %v58_v60 = vsub.s32 0, %v460_v2  ;;  %v285_v55 = vld [vmem:[#allocation2 + $0x70] sm:$0xff] }
  0x28   :  { %v170_v58 = vsel %vm146_vm2, 1, %v410_v1  ;;  %v169_v59 = vsel %vm145_vm3, 1, %v410_v1 }
  0x29   :  { %193 = vperm.xlu1 %358, %v158_v35  }
  0x2a   :  { %190 = vperm.xlu0 %357, %v157_v36  }
  0x2d   :  { %199 = vperm.xlu1 %358, %v160_v40   ;;  %v282_v40 = vld [vmem:[#allocation2 + $0x58] sm:$0xff] }
  0x2e   :  { %196 = vperm.xlu0 %357, %v159_v41  }
  0x31   :  { %205 = vperm.xlu1 %358, %v162_v44  }
  0x32   :  { %202 = vperm.xlu0 %357, %v161_v45  }
  0x35   :  { %211 = vperm.xlu1 %358, %v164_v48  }
  0x36   :  { %208 = vperm.xlu0 %357, %v163_v49   ;;  %v283_v49 = vld [vmem:[#allocation2 + $0x60] sm:$0xff] }
  0x39   :  { %217 = vperm.xlu1 %358, %v166_v52   ;;  %v286_v52 = vld [vmem:[#allocation2 + $0x78] sm:$0xff] }
  0x3a   :  { %214 = vperm.xlu0 %357, %v165_v53  }
  0x3d   :  { %223 = vperm.xlu1 %358, %v168_v56  }
  0x3e   :  { %220 = vperm.xlu0 %357, %v167_v57  }
  0x41   :  { %229 = vperm.xlu1 %358, %v170_v58   ;;  %v288_v58 = vld [vmem:[#allocation2 + $0x88] sm:$0xff] }
  0x42   :  { %226 = vperm.xlu0 %357, %v169_v59  }
  0x94   :  { %v73_v62 = vpop.permute.xlu1 %72  ;;  %v55_v63 = vpop.permute.xlu0 %54 }
  0x95   :  { %v59_v3 = vrot.slane %v55_v63, %v58_v60  ;;  %v77_v4 = vrot.slane %v73_v62, %v58_v60 }
  0x97   :  { %v67_v5 = vsub.s32 %v37_v61, %v59_v3  ;;  %v290_v3 = vld [vmem:[#allocation2 + $0x98] sm:$0xff] }
  0x98   :  { %v80_v6 = vpop.permute.xlu1 %79 }
  0x99   :  { %v62_v7 = vpop.permute.xlu0 %61  ;;  %vm543_vm4 = vcmp.ge.u32.totalorder %v67_v5, %v77_v4  ;;  %v84_v10 = vrot.slane %v80_v6, %v58_v60  ;;  %v289_v6 = vld [vmem:[#allocation2 + $0x90] sm:$0xff] }
  0x9a   :  { %v66_v9 = vrot.slane %v62_v7, %v58_v60 }
  0x9c   :  { %v68_v1 = vsub.s32 %v37_v61, %v66_v9  ;;  %v176_v12 = vpop.permute.xlu1 %175  ;;  %v287_v61 = vld [vmem:[#allocation2 + $0x80] sm:$0xff] }
  0x9d   :  { %v173_v13 = vpop.permute.xlu0 %172  ;;  %vm232_vm6 = vcmp.eq.s32.totalorder %v176_v12, 1 }
  0x9e   :  { %vm547_vm5 = vcmp.ge.u32.totalorder %v68_v1, %v84_v10  ;;  %vm231_vm7 = vcmp.eq.s32.totalorder %v173_v13, 1  ;;  %vm252_vm8 = vmand %vm543_vm4, %vm232_vm6 }
  0x9f   :  { %v292_v14 = vsel %vm252_vm8, %v272_v11, 0.0  ;;  %vm251_vm9 = vmand %vm543_vm4, %vm231_vm7 }
  0xa0   :  { %312 = vst [vmem:[#allocation5 + $0x8] sm:$0xff] %v292_v14  ;;  %v291_v15 = vsel %vm251_vm9, %v271_v0, 0.0  ;;  %v182_v17 = vpop.permute.xlu1 %181 }
  0xa1   :  { %v179_v18 = vpop.permute.xlu0 %178  ;;  %311 = vst [vmem:[#allocation5] sm:$0xff] %v291_v15  ;;  %vm234_vm10 = vcmp.eq.s32.totalorder %v182_v17, 1 }
  0xa2   :  { %vm233_vm11 = vcmp.eq.s32.totalorder %v179_v18, 1  ;;  %vm254_vm12 = vmand %vm543_vm4, %vm234_vm10 }
  0xa3   :  { %v294_v20 = vsel %vm254_vm12, %v274_v16, 0.0  ;;  %vm253_vm13 = vmand %vm543_vm4, %vm233_vm11 }
  0xa4   :  { %314 = vst [vmem:[#allocation5 + $0x18] sm:$0xff] %v294_v20  ;;  %v293_v21 = vsel %vm253_vm13, %v273_v19, 0.0  ;;  %v188_v23 = vpop.permute.xlu1 %187 }
  0xa5   :  { %v185_v24 = vpop.permute.xlu0 %184  ;;  %313 = vst [vmem:[#allocation5 + $0x10] sm:$0xff] %v293_v21  ;;  %vm236_vm14 = vcmp.eq.s32.totalorder %v188_v23, 1 }
  0xa6   :  { %vm235_vm15 = vcmp.eq.s32.totalorder %v185_v24, 1  ;;  %vm256_vm0 = vmand %vm543_vm4, %vm236_vm14 }
  0xa7   :  { %v296_v26 = vsel %vm256_vm0, %v276_v22, 0.0  ;;  %vm255_vm1 = vmand %vm543_vm4, %vm235_vm15 }
  0xa8   :  { %316 = vst [vmem:[#allocation5 + $0x28] sm:$0xff] %v296_v26  ;;  %v295_v27 = vsel %vm255_vm1, %v275_v25, 0.0  ;;  %v194_v29 = vpop.permute.xlu1 %193 }
  0xa9   :  { %v191_v30 = vpop.permute.xlu0 %190  ;;  %315 = vst [vmem:[#allocation5 + $0x20] sm:$0xff] %v295_v27  ;;  %vm238_vm2 = vcmp.eq.s32.totalorder %v194_v29, 1 }
  0xaa   :  { %vm237_vm3 = vcmp.eq.s32.totalorder %v191_v30, 1  ;;  %vm258_vm6 = vmand %vm543_vm4, %vm238_vm2 }
  0xab   :  { %v298_v32 = vsel %vm258_vm6, %v278_v28, 0.0  ;;  %vm257_vm7 = vmand %vm543_vm4, %vm237_vm3 }
  0xac   :  { %318 = vst [vmem:[#allocation5 + $0x38] sm:$0xff] %v298_v32  ;;  %v297_v33 = vsel %vm257_vm7, %v277_v31, 0.0  ;;  %v200_v35 = vpop.permute.xlu1 %199 }
  0xad   :  { %v197_v36 = vpop.permute.xlu0 %196  ;;  %317 = vst [vmem:[#allocation5 + $0x30] sm:$0xff] %v297_v33  ;;  %vm240_vm8 = vcmp.eq.s32.totalorder %v200_v35, 1 }
  0xae   :  { %vm239_vm9 = vcmp.eq.s32.totalorder %v197_v36, 1  ;;  %vm260_vm10 = vmand %vm543_vm4, %vm240_vm8 }
  0xaf   :  { %v300_v38 = vsel %vm260_vm10, %v280_v34, 0.0  ;;  %vm259_vm11 = vmand %vm543_vm4, %vm239_vm9 }
  0xb0   :  { %320 = vst [vmem:[#allocation5 + $0x48] sm:$0xff] %v300_v38  ;;  %v299_v39 = vsel %vm259_vm11, %v279_v37, 0.0  ;;  %v206_v41 = vpop.permute.xlu1 %205 }
  0xb1   :  { %v203_v42 = vpop.permute.xlu0 %202  ;;  %319 = vst [vmem:[#allocation5 + $0x40] sm:$0xff] %v299_v39  ;;  %vm242_vm12 = vcmp.eq.s32.totalorder %v206_v41, 1 }
  0xb2   :  { %vm241_vm13 = vcmp.eq.s32.totalorder %v203_v42, 1  ;;  %vm262_vm14 = vmand %vm547_vm5, %vm242_vm12 }
  0xb3   :  { %v302_v44 = vsel %vm262_vm14, %v282_v40, 0.0  ;;  %vm261_vm15 = vmand %vm547_vm5, %vm241_vm13 }
  0xb4   :  { %322 = vst [vmem:[#allocation5 + $0x58] sm:$0xff] %v302_v44  ;;  %v301_v45 = vsel %vm261_vm15, %v281_v43, 0.0  ;;  %v212_v47 = vpop.permute.xlu1 %211 }
  0xb5   :  { %v209_v48 = vpop.permute.xlu0 %208  ;;  %321 = vst [vmem:[#allocation5 + $0x50] sm:$0xff] %v301_v45  ;;  %vm244_vm4 = vcmp.eq.s32.totalorder %v212_v47, 1 }
  0xb6   :  { %vm243_vm0 = vcmp.eq.s32.totalorder %v209_v48, 1  ;;  %vm264_vm1 = vmand %vm547_vm5, %vm244_vm4 }
  0xb7   :  { %v304_v50 = vsel %vm264_vm1, %v284_v46, 0.0  ;;  %vm263_vm2 = vmand %vm547_vm5, %vm243_vm0 }
  0xb8   :  { %324 = vst [vmem:[#allocation5 + $0x68] sm:$0xff] %v304_v50  ;;  %v303_v51 = vsel %vm263_vm2, %v283_v49, 0.0  ;;  %v218_v53 = vpop.permute.xlu1 %217 }
  0xb9   :  { %v215_v54 = vpop.permute.xlu0 %214  ;;  %323 = vst [vmem:[#allocation5 + $0x60] sm:$0xff] %v303_v51  ;;  %vm246_vm3 = vcmp.eq.s32.totalorder %v218_v53, 1 }
  0xba   :  { %vm245_vm6 = vcmp.eq.s32.totalorder %v215_v54, 1  ;;  %vm266_vm7 = vmand %vm547_vm5, %vm246_vm3 }
  0xbb   :  { %v306_v56 = vsel %vm266_vm7, %v286_v52, 0.0  ;;  %vm265_vm8 = vmand %vm547_vm5, %vm245_vm6 }
  0xbc   :  { %326 = vst [vmem:[#allocation5 + $0x78] sm:$0xff] %v306_v56  ;;  %v305_v57 = vsel %vm265_vm8, %v285_v55, 0.0  ;;  %v224_v59 = vpop.permute.xlu1 %223 }
  0xbd   :  { %v221_v60 = vpop.permute.xlu0 %220  ;;  %325 = vst [vmem:[#allocation5 + $0x70] sm:$0xff] %v305_v57  ;;  %vm248_vm9 = vcmp.eq.s32.totalorder %v224_v59, 1 }
  0xbe   :  { %vm247_vm10 = vcmp.eq.s32.totalorder %v221_v60, 1  ;;  %vm268_vm11 = vmand %vm547_vm5, %vm248_vm9 }
  0xbf   :  { %v308_v62 = vsel %vm268_vm11, %v288_v58, 0.0  ;;  %vm267_vm12 = vmand %vm547_vm5, %vm247_vm10 }
  0xc0   :  { %328 = vst [vmem:[#allocation5 + $0x88] sm:$0xff] %v308_v62  ;;  %v307_v63 = vsel %vm267_vm12, %v287_v61, 0.0  ;;  %v230_v4 = vpop.permute.xlu1 %229 }
  0xc1   :  { %v227_v5 = vpop.permute.xlu0 %226  ;;  %327 = vst [vmem:[#allocation5 + $0x80] sm:$0xff] %v307_v63  ;;  %vm250_vm13 = vcmp.eq.s32.totalorder %v230_v4, 1 }
  0xc2   :  { %vm249_vm14 = vcmp.eq.s32.totalorder %v227_v5, 1  ;;  %vm270_vm15 = vmand %vm547_vm5, %vm250_vm13 }
  0xc3   :  { %v310_v7 = vsel %vm270_vm15, %v290_v3, 0.0  ;;  %vm269_vm4 = vmand %vm547_vm5, %vm249_vm14 }
  0xc4   :  { %330 = vst [vmem:[#allocation5 + $0x98] sm:$0xff] %v310_v7  ;;  %v309_v8 = vsel %vm269_vm4, %v289_v6, 0.0 }
  0xc5   :  { %329 = vst [vmem:[#allocation5 + $0x90] sm:$0xff] %v309_v8 }
  0xc6   :  { %392 = shalt.err (!%p389_p12)
}
  0xc7   :  { %s393_s23 = scalar_lea.hbm %s611_s5, 2560 }
  0xc8   :  { %p394_p13 = scmp.ne.s32.totalorder %s611_s5, %s393_s23  ;;  %p397_p0 = scmp.lt.u32.totalorder %s393_s23, %s611_s5 }
  0xca   :  { %p399_p1 = pnand %p397_p0, %p394_p13 }
  0xcc   :  { %402 = shalt.err (!%p399_p1)
}
  0xcd   :  { %342 = dma.vmem_to_hbm [thread:$0]  %s337_s3, 2560, %s611_s5, [#allocation4], %s408_s28, %s408_s28, %s409_s29  }
  0xce   :  { %405 = dma.done.wait [#allocation4], 2560  }
  0xcf   :  { %406 = vsyncadd [#allocation4], 4294964736 }
  0xd0   :  { %346 = vsyncpa [#allocation3], 1 }
  0xd1   :  { %347 = vsyncpa [#allocation4], 1 }

</bundles_post_ra>
